<compile_context>
chip_gen: v6e
topology: v6e:2x2x1
jax: 0.10.0
libtpu: 0.0.40
codegen_flags: <defaults>
</compile_context>

<pallas_src>
import math
import functools

import jax
import jax.numpy as jnp
import numpy as np
from jax.experimental import pallas as pl
from jax.experimental.pallas import tpu as pltpu


def _round_up(x, m):
    return ((x + m - 1) // m) * m


def _lgm_kernel(feat_ref, labels_ref, means_ref, bias_ref,
                neg_ref, partial_ref,
                m_sc, l_sc, corr_sc, hfsq_sc,
                *, margin, batch, tile_b):
    i = pl.program_id(0)          # batch-tile index ("parallel")
    j = pl.program_id(1)          # class-tile index ("arbitrary", innermost)
    nc = pl.num_programs(1)

    feat = feat_ref[...]          # (TB, D), native dtype, fed to the MXU as-is
    tb, tc = neg_ref.shape

    # Per-batch-tile init (first class tile of each i).
    @pl.when(j == 0)
    def _():
        f32 = feat.astype(jnp.float32)
        hfsq_sc[...] = -0.5 * jnp.sum(f32 * f32, axis=1, keepdims=True)
        m_sc[...] = jnp.full(m_sc.shape, -jnp.inf, m_sc.dtype)
        l_sc[...] = jnp.zeros(l_sc.shape, l_sc.dtype)
        corr_sc[...] = jnp.zeros(corr_sc.shape, corr_sc.dtype)

    # MXU: feat @ means^T block, f32 accumulate (means pre-transposed in wrapper).
    fm = jnp.dot(feat, means_ref[...], preferred_element_type=jnp.float32)   # (TB, TC)

    # Fused epilogue: -0.5||f-m||^2 = f.m - 0.5||f||^2 - 0.5||m||^2.
    # bias_ref holds -0.5||m||^2 for real classes and -1e30 for padded class
    # columns, so the softmax below needs no extra masking.
    neg = fm + hfsq_sc[...] + bias_ref[...]                                   # (TB, TC)
    neg_ref[...] = neg

    labels = labels_ref[...]                                                  # (TB, 1) int32
    class_ids = j * tc + jax.lax.broadcasted_iota(jnp.int32, (tb, tc), 1)
    onehot = (class_ids == labels).astype(jnp.float32)
    logits = neg * (1.0 + margin * onehot)

    # Online (flash-style) max / sum-exp across class tiles.
    m_prev = m_sc[...]
    m_new = jnp.maximum(m_prev, jnp.max(logits, axis=1, keepdims=True))
    alpha = jnp.exp(m_prev - m_new)
    l_sc[...] = alpha * l_sc[...] + jnp.sum(jnp.exp(logits - m_new),
                                            axis=1, keepdims=True)
    m_sc[...] = m_new
    corr_sc[...] = corr_sc[...] + jnp.sum(onehot * neg, axis=1, keepdims=True)

    # Finalize per batch tile: masked partial CE / regularizer sums.
    @pl.when(j == nc - 1)
    def _():
        lse = m_sc[...] + jnp.log(l_sc[...])                                  # (TB, 1)
        correct_neg = corr_sc[...]
        correct_logit = correct_neg * (1.0 + margin)
        row_ids = i * tile_b + jax.lax.broadcasted_iota(jnp.int32, (tb, 1), 0)
        row_valid = row_ids < batch
        # jnp.where (not multiply-by-mask) so garbage tail rows can't inject NaN.
        ce_sum = jnp.sum(jnp.where(row_valid, lse - correct_logit, 0.0))
        reg_sum = jnp.sum(jnp.where(row_valid, -correct_neg, 0.0))
        ri = jax.lax.broadcasted_iota(jnp.int32, (8, 128), 0)
        ci = jax.lax.broadcasted_iota(jnp.int32, (8, 128), 1)
        partial_ref[...] = jnp.where((ri == 0) & (ci == 0), ce_sum,
                                     jnp.where((ri == 0) & (ci == 1), reg_sum, 0.0))


def _vmem_bytes(tile_b, tile_c, d, in_itemsize, means_bufs=2):
    """Estimated per-core VMEM footprint: pipeline buffers + scratch + temps."""
    b = 0
    b += means_bufs * d * tile_c * in_itemsize      # means^T tile(s)
    b += means_bufs * 8 * tile_c * 4                # bias row (sublane-padded)
    b += 2 * tile_b * d * in_itemsize               # feat tiles (double-buffered)
    b += 2 * tile_b * 128 * 4                       # labels (lane-padded int32)
    b += 2 * tile_b * tile_c * 4                    # neg output tiles
    b += 2 * 8 * 128 * 4                            # partial-sum tile
    b += 4 * tile_b * 128 * 4                       # scratch m/l/corr/-0.5||f||^2
    b += 6 * tile_b * tile_c * 4                    # live f32 temporaries (fm, neg, onehot, logits, exp, iota)
    return b


def lgm_loss(feat, labels, means, *, margin=0.1, lambda_=0.01,
             tile_b=None, tile_c=None):
    """Pallas TPU implementation of LGMLoss.forward.

    feat: (B, D) float; labels: (B,) int; means: (C, D) float.
    Returns (loss, neg_sqr_dist, logits_with_margin, classification_loss,
             likelihood_reg_loss), matching the PyTorch module.
    tile_b / tile_c: optional manual tile override (both must be given).
    """
    B, D = feat.shape
    C = means.shape[0]
    in_dtype = feat.dtype
    itemsize = jnp.dtype(in_dtype).itemsize

    # Generation-aware VMEM budget (v5e/v6e: 128 MiB/core, v7x: 64 MiB/core).
    try:
        vmem_cap = int(pltpu.get_tpu_info().vmem_capacity_bytes)
    except Exception:
        vmem_cap = 64 * 1024 * 1024
    budget = (7 * vmem_cap) // 10     # ~90 MiB on v5e/v6e, ~45 MiB on v7x

    # Cap the batch tile so the "parallel" batch axis has >=2 (up to 4) steps
    # when B is large enough -> both v7x TensorCores get work.
    tb_cap = _round_up(max(B, 8), 8)
    if B >= 1024:
        tb_cap = min(tb_cap, _round_up(pl.cdiv(B, 4), 8))
    elif B >= 256:
        tb_cap = min(tb_cap, _round_up(pl.cdiv(B, 2), 8))
    tb_cap = min(tb_cap, 1024)

    if tile_b is not None and tile_c is not None:
        tile_b = max(8, _round_up(int(tile_b), 8))
        tile_c = max(128, _round_up(int(tile_c), 128))
    else:
        c_base = _round_up(max(C, 128), 128)
        tc_cands = [c_base] + [t for t in (4096, 2048, 1024, 512, 256, 128)
                               if t < c_base]
        tb_cands = sorted({t for t in (1024, 512, 256, 128, 64, 32, 16, 8, tb_cap)
                           if t <= tb_cap}, reverse=True)
        target_tb = min(256, tb_cap)
        best = None
        for tc in tc_cands:                 # prefer no class tiling when possible
            fit_tb = None
            for tb in tb_cands:             # biggest batch tile that fits
                if _vmem_bytes(tb, tc, D, itemsize) <= budget:
                    fit_tb = tb
                    break
            if fit_tb is None:
                continue
            if best is None or fit_tb > best[0]:
                best = (fit_tb, tc)
            if fit_tb >= target_tb:         # keep tile_b large even for huge C
                best = (fit_tb, tc)
                break
        tile_b, tile_c = best if best is not None else (8, 128)

    c_pad = _round_up(max(C, tile_c), tile_c)
    nb = pl.cdiv(B, tile_b)
    nc = c_pad // tile_c

    est = _vmem_bytes(tile_b, tile_c, D, itemsize)
    vmem_limit = int(min(max(vmem_cap - 2 * 1024 * 1024, 16 * 1024 * 1024),
                         max(32 * 1024 * 1024, est + 4 * 1024 * 1024)))

    # One-time wrapper-side prep (no per-step transpose, no feat padding).
    labels2 = labels.astype(jnp.int32).reshape(B, 1)
    means_c = means.astype(in_dtype)
    means_t = jnp.pad(means_c, ((0, c_pad - C), (0, 0))).T            # (D, c_pad)
    m32 = means_c.astype(jnp.float32)
    msq = -0.5 * jnp.sum(m32 * m32, axis=1)                           # (C,)
    bias = jnp.full((c_pad,), -1e30, jnp.float32).at[:C].set(msq).reshape(1, c_pad)

    kernel = functools.partial(_lgm_kernel, margin=float(margin),
                               batch=B, tile_b=tile_b)

    out_shapes = (
        jax.ShapeDtypeStruct((B, c_pad), jnp.float32),                # neg_sqr_dist (class-padded)
        jax.ShapeDtypeStruct((nb * 8, 128), jnp.float32),             # per-tile partial sums
    )
    out_specs = (
        pl.BlockSpec((tile_b, tile_c), lambda i, j: (i, j)),
        pl.BlockSpec((8, 128), lambda i, j: (i, 0)),
    )
    scratch = [pltpu.VMEM((tile_b, 1), jnp.float32)] * 4              # m, l, corr, -0.5||f||^2

    def _call(single_buffer_resident):
        kw = ({"pipeline_mode": pl.Buffered(buffer_count=1)}
              if single_buffer_resident else {})
        in_specs = [
            pl.BlockSpec((tile_b, D), lambda i, j: (i, 0)),           # feat tile
            pl.BlockSpec((tile_b, 1), lambda i, j: (i, 0)),           # labels tile
            pl.BlockSpec((D, tile_c), lambda i, j: (0, j), **kw),     # means^T tile
            pl.BlockSpec((1, tile_c), lambda i, j: (0, j), **kw),     # bias row
        ]
        return pl.pallas_call(
            kernel,
            out_shape=out_shapes,
            grid=(nb, nc),
            in_specs=in_specs,
            out_specs=out_specs,
            scratch_shapes=scratch,
            compiler_params=pltpu.CompilerParams(
                dimension_semantics=("parallel", "arbitrary"),
                vmem_limit_bytes=vmem_limit),
        )(feat, labels2, means_t, bias)

    if nc == 1:
        # means/bias are grid-invariant -> single buffer saves half their VMEM.
        try:
            neg_p, partial = _call(True)
        except Exception:   # this JAX build rejects per-BlockSpec pipeline_mode
            neg_p, partial = _call(False)
    else:
        neg_p, partial = _call(False)

    # Tiny wrapper finalize: 1/B and lambda applied exactly once.
    partial = partial.reshape(nb, 8, 128)
    inv_b = 1.0 / B
    ce = jnp.sum(partial[:, 0, 0]) * inv_b
    reg = (float(lambda_) * inv_b) * jnp.sum(partial[:, 0, 1])
    loss = ce + reg

    neg = neg_p[:, :C]
    # logits differ from neg only at the label column -> reconstruct here
    # instead of writing a second full (B, C) f32 array from the kernel.
    onehot = jax.nn.one_hot(labels, C, dtype=jnp.float32)
    logits = neg * (1.0 + float(margin) * onehot)
    return (loss, neg, logits, ce, reg)


def _reference(feat, labels, means, margin=0.1, lambda_=0.01):
    """Pure-JAX reference mirroring the PyTorch forward."""
    B = feat.shape[0]
    C = means.shape[0]
    diff = feat[:, :, None] - means.T[None, :, :]            # (B, D, C)
    neg_sqr_dist = -0.5 * jnp.sum(diff ** 2, axis=1)         # (B, C)
    onehot = jax.nn.one_hot(labels, C, dtype=feat.dtype)
    K = 1.0 + margin * onehot
    logits = neg_sqr_dist * K
    logp = jax.nn.log_softmax(logits, axis=1)
    ce = -jnp.mean(jnp.sum(onehot * logp, axis=1))
    means_batch = means[labels]
    reg = lambda_ * (jnp.sum((feat - means_batch) ** 2) / 2) * (1.0 / B)
    return ce + reg, neg_sqr_dist, logits, ce, reg


if __name__ == "__main__":
    margin = 0.1
    lambda_ = 0.01

    def _run_case(key, batch, num_classes, feat_dim, rtol, atol, **tile_kw):
        k_feat, k_means, k_lab = jax.random.split(key, 3)
        # Deterministic init matching nn.init.xavier_uniform_(gain=sqrt(2)).
        gain = math.sqrt(2.0)
        limit = gain * math.sqrt(6.0 / (num_classes + feat_dim))
        means = jax.random.uniform(k_means, (num_classes, feat_dim),
                                   minval=-limit, maxval=limit, dtype=jnp.float32)
        feat = jax.random.normal(k_feat, (batch, feat_dim), dtype=jnp.float32)
        labels = jax.random.randint(k_lab, (batch,), 0, num_classes,
                                    dtype=jnp.int32)

        outs = lgm_loss(feat, labels, means, margin=margin, lambda_=lambda_,
                        **tile_kw)
        outs = jax.block_until_ready(outs)
        refs = _reference(feat, labels, means, margin=margin, lambda_=lambda_)
        for o, r in zip(outs, refs):
            np.testing.assert_allclose(np.asarray(o), np.asarray(r),
                                       rtol=rtol, atol=atol)

    key = jax.random.PRNGKey(0)
    k1, k2 = jax.random.split(key)

    # Small case at the module's natural shapes (single batch/class tile path).
    _run_case(k1, batch=8, num_classes=4, feat_dim=32, rtol=1e-4, atol=1e-4)
    # Exercises partial tail batch block + class-dim tiling + multiple b tiles.
    _run_case(k2, batch=37, num_classes=300, feat_dim=64,
              rtol=2e-3, atol=2e-3, tile_b=16, tile_c=128)

    print("KERNEL_OK")
</pallas_src>

<mosaic_0001>
module attributes {stable_mosaic.version = 11 : i64} {
  func.func @_lgm_kernel(%arg0: i32, %arg1: i32, %arg2: memref<8x32xf32, #tpu.memory_space<vmem>>, %arg3: memref<8x1xi32, #tpu.memory_space<vmem>>, %arg4: memref<32x128xf32, #tpu.memory_space<vmem>>, %arg5: memref<1x128xf32, #tpu.memory_space<vmem>>, %arg6: memref<8x128xf32, #tpu.memory_space<vmem>>, %arg7: memref<8x128xf32, #tpu.memory_space<vmem>>, %arg8: memref<8x1xf32, #tpu.memory_space<vmem>>, %arg9: memref<8x1xf32, #tpu.memory_space<vmem>>, %arg10: memref<8x1xf32, #tpu.memory_space<vmem>>, %arg11: memref<8x1xf32, #tpu.memory_space<vmem>>) attributes {dimension_semantics = [#tpu.dimension_semantics<parallel>, #tpu.dimension_semantics<arbitrary>], iteration_bounds = array<i64: 1, 1>, scalar_prefetch = 0 : i64, scratch_operands = 4 : i64, tpu.core_type = #tpu.core_type<tc>, window_params = [{transform_indices = @transform_0, window_bounds = array<i64: 8, 32>}, {transform_indices = @transform_1, window_bounds = array<i64: 8, 1>}, {pipeline_mode = #tpu.pipeline_mode<synchronous>, transform_indices = @transform_2, window_bounds = array<i64: 32, 128>}, {pipeline_mode = #tpu.pipeline_mode<synchronous>, transform_indices = @transform_3, window_bounds = array<i64: 1, 128>}, {transform_indices = @transform_4, window_bounds = array<i64: 8, 128>}, {transform_indices = @transform_5, window_bounds = array<i64: 8, 128>}]} {
    %c0 = arith.constant 0 : index
    %c0_0 = arith.constant 0 : index
    %0 = vector.load %arg2[%c0, %c0_0] : memref<8x32xf32, #tpu.memory_space<vmem>>, vector<8x32xf32>
    %c0_i32 = arith.constant 0 : i32
    %1 = arith.cmpi eq, %arg1, %c0_i32 : i32
    %2 = arith.extui %1 : i1 to i32
    %c0_i32_1 = arith.constant 0 : i32
    %3 = arith.cmpi ne, %2, %c0_i32_1 : i32
    scf.if %3 {
      %52 = arith.mulf %0, %0 : vector<8x32xf32>
      %cst_31 = arith.constant dense<0.000000e+00> : vector<8xf32>
      %53 = vector.multi_reduction <add>, %52, %cst_31 [1] : vector<8x32xf32> to vector<8xf32>
      %54 = vector.shape_cast %53 : vector<8xf32> to vector<8x1xf32>
      %cst_32 = arith.constant -5.000000e-01 : f32
      %55 = vector.broadcast %cst_32 : f32 to vector<8x1xf32>
      %56 = arith.mulf %55, %54 : vector<8x1xf32>
      %c0_33 = arith.constant 0 : index
      %c0_34 = arith.constant 0 : index
      %57 = vector.load %arg11[%c0_33, %c0_34] : memref<8x1xf32, #tpu.memory_space<vmem>>, vector<8x1xf32>
      tpu.vector_store %arg11[%c0_33, %c0_34], %56 {strides = array<i32>} : memref<8x1xf32, #tpu.memory_space<vmem>>, vector<8x1xf32>,
      %cst_35 = arith.constant 0xFF800000 : f32
      %58 = vector.broadcast %cst_35 : f32 to vector<8x1xf32>
      %c0_36 = arith.constant 0 : index
      %c0_37 = arith.constant 0 : index
      %59 = vector.load %arg8[%c0_36, %c0_37] : memref<8x1xf32, #tpu.memory_space<vmem>>, vector<8x1xf32>
      tpu.vector_store %arg8[%c0_36, %c0_37], %58 {strides = array<i32>} : memref<8x1xf32, #tpu.memory_space<vmem>>, vector<8x1xf32>,
      %cst_38 = arith.constant 0.000000e+00 : f32
      %60 = vector.broadcast %cst_38 : f32 to vector<8x1xf32>
      %c0_39 = arith.constant 0 : index
      %c0_40 = arith.constant 0 : index
      %61 = vector.load %arg9[%c0_39, %c0_40] : memref<8x1xf32, #tpu.memory_space<vmem>>, vector<8x1xf32>
      tpu.vector_store %arg9[%c0_39, %c0_40], %60 {strides = array<i32>} : memref<8x1xf32, #tpu.memory_space<vmem>>, vector<8x1xf32>,
      %cst_41 = arith.constant 0.000000e+00 : f32
      %62 = vector.broadcast %cst_41 : f32 to vector<8x1xf32>
      %c0_42 = arith.constant 0 : index
      %c0_43 = arith.constant 0 : index
      %63 = vector.load %arg10[%c0_42, %c0_43] : memref<8x1xf32, #tpu.memory_space<vmem>>, vector<8x1xf32>
      tpu.vector_store %arg10[%c0_42, %c0_43], %62 {strides = array<i32>} : memref<8x1xf32, #tpu.memory_space<vmem>>, vector<8x1xf32>,
    } else {
    }
    %c0_2 = arith.constant 0 : index
    %c0_3 = arith.constant 0 : index
    %4 = vector.load %arg4[%c0_2, %c0_3] : memref<32x128xf32, #tpu.memory_space<vmem>>, vector<32x128xf32>
    %cst = arith.constant dense<0.000000e+00> : vector<8x128xf32>
    %5 = tpu.matmul %0, %4, %cst {dimension_numbers = #tpu.dot_dimension_numbers<[1], [0], [0], [1], [0, 0, 1, 1], [], []>} : vector<8x32xf32>, vector<32x128xf32>, vector<8x128xf32> -> vector<8x128xf32>
    %c0_4 = arith.constant 0 : index
    %c0_5 = arith.constant 0 : index
    %6 = vector.load %arg11[%c0_4, %c0_5] : memref<8x1xf32, #tpu.memory_space<vmem>>, vector<8x1xf32>
    %7 = vector.broadcast %6 : vector<8x1xf32> to vector<8x128xf32>
    %8 = arith.addf %5, %7 : vector<8x128xf32>
    %c0_6 = arith.constant 0 : index
    %c0_7 = arith.constant 0 : index
    %9 = vector.load %arg5[%c0_6, %c0_7] : memref<1x128xf32, #tpu.memory_space<vmem>>, vector<1x128xf32>
    %10 = vector.broadcast %9 : vector<1x128xf32> to vector<8x128xf32>
    %11 = arith.addf %8, %10 : vector<8x128xf32>
    %c0_8 = arith.constant 0 : index
    %c0_9 = arith.constant 0 : index
    %12 = vector.load %arg6[%c0_8, %c0_9] : memref<8x128xf32, #tpu.memory_space<vmem>>, vector<8x128xf32>
    tpu.vector_store %arg6[%c0_8, %c0_9], %11 {strides = array<i32>} : memref<8x128xf32, #tpu.memory_space<vmem>>, vector<8x128xf32>,
    %c0_10 = arith.constant 0 : index
    %c0_11 = arith.constant 0 : index
    %13 = vector.load %arg3[%c0_10, %c0_11] : memref<8x1xi32, #tpu.memory_space<vmem>>, vector<8x1xi32>
    %c128_i32 = arith.constant 128 : i32
    %14 = arith.muli %arg1, %c128_i32 : i32
    %15 = tpu.iota {dimensions = array<i32: 1>} : vector<8x128xi32>
    %16 = vector.broadcast %14 : i32 to vector<8x128xi32>
    %17 = arith.addi %16, %15 : vector<8x128xi32>
    %18 = vector.broadcast %13 : vector<8x1xi32> to vector<8x128xi32>
    %19 = arith.cmpi eq, %17, %18 : vector<8x128xi32>
    %20 = arith.extui %19 : vector<8x128xi1> to vector<8x128xi32>
    %21 = arith.sitofp %20 : vector<8x128xi32> to vector<8x128xf32>
    %cst_12 = arith.constant 1.000000e-01 : f32
    %22 = vector.broadcast %cst_12 : f32 to vector<8x128xf32>
    %23 = arith.mulf %22, %21 : vector<8x128xf32>
    %cst_13 = arith.constant 1.000000e+00 : f32
    %24 = vector.broadcast %cst_13 : f32 to vector<8x128xf32>
    %25 = arith.addf %24, %23 : vector<8x128xf32>
    %26 = arith.mulf %11, %25 : vector<8x128xf32>
    %c0_14 = arith.constant 0 : index
    %c0_15 = arith.constant 0 : index
    %27 = vector.load %arg8[%c0_14, %c0_15] : memref<8x1xf32, #tpu.memory_space<vmem>>, vector<8x1xf32>
    %cst_16 = arith.constant dense<0xFF800000> : vector<8xf32>
    %28 = vector.multi_reduction <maximumf>, %26, %cst_16 [1] : vector<8x128xf32> to vector<8xf32>
    %29 = vector.shape_cast %28 : vector<8xf32> to vector<8x1xf32>
    %30 = arith.maximumf %27, %29 : vector<8x1xf32>
    %31 = arith.subf %27, %30 : vector<8x1xf32>
    %32 = math.exp %31 : vector<8x1xf32>
    %c0_17 = arith.constant 0 : index
    %c0_18 = arith.constant 0 : index
    %33 = vector.load %arg9[%c0_17, %c0_18] : memref<8x1xf32, #tpu.memory_space<vmem>>, vector<8x1xf32>
    %34 = arith.mulf %32, %33 : vector<8x1xf32>
    %35 = vector.broadcast %30 : vector<8x1xf32> to vector<8x128xf32>
    %36 = arith.subf %26, %35 : vector<8x128xf32>
    %37 = math.exp %36 : vector<8x128xf32>
    %cst_19 = arith.constant dense<0.000000e+00> : vector<8xf32>
    %38 = vector.multi_reduction <add>, %37, %cst_19 [1] : vector<8x128xf32> to vector<8xf32>
    %39 = vector.shape_cast %38 : vector<8xf32> to vector<8x1xf32>
    %40 = arith.addf %34, %39 : vector<8x1xf32>
    %c0_20 = arith.constant 0 : index
    %c0_21 = arith.constant 0 : index
    %41 = vector.load %arg9[%c0_20, %c0_21] : memref<8x1xf32, #tpu.memory_space<vmem>>, vector<8x1xf32>
    tpu.vector_store %arg9[%c0_20, %c0_21], %40 {strides = array<i32>} : memref<8x1xf32, #tpu.memory_space<vmem>>, vector<8x1xf32>,
    %c0_22 = arith.constant 0 : index
    %c0_23 = arith.constant 0 : index
    %42 = vector.load %arg8[%c0_22, %c0_23] : memref<8x1xf32, #tpu.memory_space<vmem>>, vector<8x1xf32>
    tpu.vector_store %arg8[%c0_22, %c0_23], %30 {strides = array<i32>} : memref<8x1xf32, #tpu.memory_space<vmem>>, vector<8x1xf32>,
    %c0_24 = arith.constant 0 : index
    %c0_25 = arith.constant 0 : index
    %43 = vector.load %arg10[%c0_24, %c0_25] : memref<8x1xf32, #tpu.memory_space<vmem>>, vector<8x1xf32>
    %44 = arith.mulf %21, %11 : vector<8x128xf32>
    %cst_26 = arith.constant dense<0.000000e+00> : vector<8xf32>
    %45 = vector.multi_reduction <add>, %44, %cst_26 [1] : vector<8x128xf32> to vector<8xf32>
    %46 = vector.shape_cast %45 : vector<8xf32> to vector<8x1xf32>
    %47 = arith.addf %43, %46 : vector<8x1xf32>
    %c0_27 = arith.constant 0 : index
    %c0_28 = arith.constant 0 : index
    %48 = vector.load %arg10[%c0_27, %c0_28] : memref<8x1xf32, #tpu.memory_space<vmem>>, vector<8x1xf32>
    tpu.vector_store %arg10[%c0_27, %c0_28], %47 {strides = array<i32>} : memref<8x1xf32, #tpu.memory_space<vmem>>, vector<8x1xf32>,
    %c0_i32_29 = arith.constant 0 : i32
    %49 = arith.cmpi eq, %arg1, %c0_i32_29 : i32
    %50 = arith.extui %49 : i1 to i32
    %c0_i32_30 = arith.constant 0 : i32
    %51 = arith.cmpi ne, %50, %c0_i32_30 : i32
    scf.if %51 {
      %c0_31 = arith.constant 0 : index
      %c0_32 = arith.constant 0 : index
      %52 = vector.load %arg8[%c0_31, %c0_32] : memref<8x1xf32, #tpu.memory_space<vmem>>, vector<8x1xf32>
      %c0_33 = arith.constant 0 : index
      %c0_34 = arith.constant 0 : index
      %53 = vector.load %arg9[%c0_33, %c0_34] : memref<8x1xf32, #tpu.memory_space<vmem>>, vector<8x1xf32>
      %54 = math.log %53 : vector<8x1xf32>
      %55 = arith.addf %52, %54 : vector<8x1xf32>
      %c0_35 = arith.constant 0 : index
      %c0_36 = arith.constant 0 : index
      %56 = vector.load %arg10[%c0_35, %c0_36] : memref<8x1xf32, #tpu.memory_space<vmem>>, vector<8x1xf32>
      %cst_37 = arith.constant 1.100000e+00 : f32
      %57 = vector.broadcast %cst_37 : f32 to vector<8x1xf32>
      %58 = arith.mulf %56, %57 : vector<8x1xf32>
      %c8_i32 = arith.constant 8 : i32
      %59 = arith.muli %arg0, %c8_i32 : i32
      %60 = tpu.iota {dimensions = array<i32: 0>} : vector<8x1xi32>
      %61 = vector.broadcast %59 : i32 to vector<8x1xi32>
      %62 = arith.addi %61, %60 : vector<8x1xi32>
      %c8_i32_38 = arith.constant 8 : i32
      %63 = vector.broadcast %c8_i32_38 : i32 to vector<8x1xi32>
      %64 = arith.cmpi slt, %62, %63 : vector<8x1xi32>
      %65 = arith.subf %55, %58 : vector<8x1xf32>
      %cst_39 = arith.constant 0.000000e+00 : f32
      %66 = vector.broadcast %cst_39 : f32 to vector<8x1xf32>
      %67 = arith.select %64, %65, %66 : vector<8x1xi1>, vector<8x1xf32>
      %68 = vector.shape_cast %67 : vector<8x1xf32> to vector<1x8x1xf32>
      %cst_40 = arith.constant dense<0.000000e+00> : vector<1xf32>
      %69 = vector.multi_reduction <add>, %68, %cst_40 [1, 2] : vector<1x8x1xf32> to vector<1xf32>
      %70 = vector.shape_cast %69 : vector<1xf32> to vector<1x1x1xf32>
      %71 = vector.extract %70[0, 0, 0] : f32 from vector<1x1x1xf32>
      %cst_41 = arith.constant 0.000000e+00 : f32
      %72 = vector.broadcast %cst_41 : f32 to vector<8x1xf32>
      %73 = arith.subf %72, %56 : vector<8x1xf32>
      %cst_42 = arith.constant 0.000000e+00 : f32
      %74 = vector.broadcast %cst_42 : f32 to vector<8x1xf32>
      %75 = arith.select %64, %73, %74 : vector<8x1xi1>, vector<8x1xf32>
      %76 = vector.shape_cast %75 : vector<8x1xf32> to vector<1x8x1xf32>
      %cst_43 = arith.constant dense<0.000000e+00> : vector<1xf32>
      %77 = vector.multi_reduction <add>, %76, %cst_43 [1, 2] : vector<1x8x1xf32> to vector<1xf32>
      %78 = vector.shape_cast %77 : vector<1xf32> to vector<1x1x1xf32>
      %79 = vector.extract %78[0, 0, 0] : f32 from vector<1x1x1xf32>
      %80 = tpu.iota {dimensions = array<i32: 0>} : vector<8x128xi32>
      %81 = tpu.iota {dimensions = array<i32: 1>} : vector<8x128xi32>
      %c0_i32_44 = arith.constant 0 : i32
      %82 = vector.broadcast %c0_i32_44 : i32 to vector<8x128xi32>
      %83 = arith.cmpi eq, %80, %82 : vector<8x128xi32>
      %c0_i32_45 = arith.constant 0 : i32
      %84 = vector.broadcast %c0_i32_45 : i32 to vector<8x128xi32>
      %85 = arith.cmpi eq, %81, %84 : vector<8x128xi32>
      %86 = arith.andi %83, %85 : vector<8x128xi1>
      %c0_i32_46 = arith.constant 0 : i32
      %87 = vector.broadcast %c0_i32_46 : i32 to vector<8x128xi32>
      %88 = arith.cmpi eq, %80, %87 : vector<8x128xi32>
      %c1_i32 = arith.constant 1 : i32
      %89 = vector.broadcast %c1_i32 : i32 to vector<8x128xi32>
      %90 = arith.cmpi eq, %81, %89 : vector<8x128xi32>
      %91 = arith.andi %88, %90 : vector<8x128xi1>
      %cst_47 = arith.constant 0.000000e+00 : f32
      %92 = vector.broadcast %79 : f32 to vector<8x128xf32>
      %93 = vector.broadcast %cst_47 : f32 to vector<8x128xf32>
      %94 = arith.select %91, %92, %93 : vector<8x128xi1>, vector<8x128xf32>
      %95 = vector.broadcast %71 : f32 to vector<8x128xf32>
      %96 = arith.select %86, %95, %94 : vector<8x128xi1>, vector<8x128xf32>
      %c0_48 = arith.constant 0 : index
      %c0_49 = arith.constant 0 : index
      %97 = vector.load %arg7[%c0_48, %c0_49] : memref<8x128xf32, #tpu.memory_space<vmem>>, vector<8x128xf32>
      tpu.vector_store %arg7[%c0_48, %c0_49], %96 {strides = array<i32>} : memref<8x128xf32, #tpu.memory_space<vmem>>, vector<8x128xf32>,
    } else {
    }
    return
  }
  func.func @transform_0(%arg0: i32, %arg1: i32) -> (i32, i32) {
    %c0_i32 = arith.constant 0 : i32
    %c0_i32_0 = arith.constant 0 : i32
    return %arg0, %c0_i32 : i32, i32
  }
  func.func @transform_1(%arg0: i32, %arg1: i32) -> (i32, i32) {
    %c0_i32 = arith.constant 0 : i32
    %c0_i32_0 = arith.constant 0 : i32
    return %arg0, %c0_i32 : i32, i32
  }
  func.func @transform_2(%arg0: i32, %arg1: i32) -> (i32, i32) {
    %c0_i32 = arith.constant 0 : i32
    %c0_i32_0 = arith.constant 0 : i32
    return %c0_i32, %arg1 : i32, i32
  }
  func.func @transform_3(%arg0: i32, %arg1: i32) -> (i32, i32) {
    %c0_i32 = arith.constant 0 : i32
    %c0_i32_0 = arith.constant 0 : i32
    return %c0_i32, %arg1 : i32, i32
  }
  func.func @transform_4(%arg0: i32, %arg1: i32) -> (i32, i32) {
    %c0_i32 = arith.constant 0 : i32
    return %arg0, %arg1 : i32, i32
  }
  func.func @transform_5(%arg0: i32, %arg1: i32) -> (i32, i32) {
    %c0_i32 = arith.constant 0 : i32
    %c0_i32_0 = arith.constant 0 : i32
    return %arg0, %c0_i32 : i32, i32
  }
}

module attributes {stable_mosaic.version = 11 : i64} {
  func.func @_lgm_kernel(%arg0: i32, %arg1: i32, %arg2: memref<8x32xf32, #tpu.memory_space<vmem>>, %arg3: memref<8x1xi32, #tpu.memory_space<vmem>>, %arg4: memref<32x128xf32, #tpu.memory_space<vmem>>, %arg5: memref<1x128xf32, #tpu.memory_space<vmem>>, %arg6: memref<8x128xf32, #tpu.memory_space<vmem>>, %arg7: memref<8x128xf32, #tpu.memory_space<vmem>>, %arg8: memref<8x1xf32, #tpu.memory_space<vmem>>, %arg9: memref<8x1xf32, #tpu.memory_space<vmem>>, %arg10: memref<8x1xf32, #tpu.memory_space<vmem>>, %arg11: memref<8x1xf32, #tpu.memory_space<vmem>>) attributes {dimension_semantics = [#tpu.dimension_semantics<parallel>, #tpu.dimension_semantics<arbitrary>], iteration_bounds = array<i64: 1, 1>, scalar_prefetch = 0 : i64, scratch_operands = 4 : i64, tpu.core_type = #tpu.core_type<tc>, window_params = [{transform_indices = @transform_0, window_bounds = array<i64: 8, 32>}, {transform_indices = @transform_1, window_bounds = array<i64: 8, 1>}, {transform_indices = @transform_2, window_bounds = array<i64: 32, 128>}, {transform_indices = @transform_3, window_bounds = array<i64: 1, 128>}, {transform_indices = @transform_4, window_bounds = array<i64: 8, 128>}, {transform_indices = @transform_5, window_bounds = array<i64: 8, 128>}]} {
    %c0 = arith.constant 0 : index
    %c0_0 = arith.constant 0 : index
    %0 = vector.load %arg2[%c0, %c0_0] : memref<8x32xf32, #tpu.memory_space<vmem>>, vector<8x32xf32>
    %c0_i32 = arith.constant 0 : i32
    %1 = arith.cmpi eq, %arg1, %c0_i32 : i32
    %2 = arith.extui %1 : i1 to i32
    %c0_i32_1 = arith.constant 0 : i32
    %3 = arith.cmpi ne, %2, %c0_i32_1 : i32
    scf.if %3 {
      %52 = arith.mulf %0, %0 : vector<8x32xf32>
      %cst_31 = arith.constant dense<0.000000e+00> : vector<8xf32>
      %53 = vector.multi_reduction <add>, %52, %cst_31 [1] : vector<8x32xf32> to vector<8xf32>
      %54 = vector.shape_cast %53 : vector<8xf32> to vector<8x1xf32>
      %cst_32 = arith.constant -5.000000e-01 : f32
      %55 = vector.broadcast %cst_32 : f32 to vector<8x1xf32>
      %56 = arith.mulf %55, %54 : vector<8x1xf32>
      %c0_33 = arith.constant 0 : index
      %c0_34 = arith.constant 0 : index
      %57 = vector.load %arg11[%c0_33, %c0_34] : memref<8x1xf32, #tpu.memory_space<vmem>>, vector<8x1xf32>
      tpu.vector_store %arg11[%c0_33, %c0_34], %56 {strides = array<i32>} : memref<8x1xf32, #tpu.memory_space<vmem>>, vector<8x1xf32>,
      %cst_35 = arith.constant 0xFF800000 : f32
      %58 = vector.broadcast %cst_35 : f32 to vector<8x1xf32>
      %c0_36 = arith.constant 0 : index
      %c0_37 = arith.constant 0 : index
      %59 = vector.load %arg8[%c0_36, %c0_37] : memref<8x1xf32, #tpu.memory_space<vmem>>, vector<8x1xf32>
      tpu.vector_store %arg8[%c0_36, %c0_37], %58 {strides = array<i32>} : memref<8x1xf32, #tpu.memory_space<vmem>>, vector<8x1xf32>,
      %cst_38 = arith.constant 0.000000e+00 : f32
      %60 = vector.broadcast %cst_38 : f32 to vector<8x1xf32>
      %c0_39 = arith.constant 0 : index
      %c0_40 = arith.constant 0 : index
      %61 = vector.load %arg9[%c0_39, %c0_40] : memref<8x1xf32, #tpu.memory_space<vmem>>, vector<8x1xf32>
      tpu.vector_store %arg9[%c0_39, %c0_40], %60 {strides = array<i32>} : memref<8x1xf32, #tpu.memory_space<vmem>>, vector<8x1xf32>,
      %cst_41 = arith.constant 0.000000e+00 : f32
      %62 = vector.broadcast %cst_41 : f32 to vector<8x1xf32>
      %c0_42 = arith.constant 0 : index
      %c0_43 = arith.constant 0 : index
      %63 = vector.load %arg10[%c0_42, %c0_43] : memref<8x1xf32, #tpu.memory_space<vmem>>, vector<8x1xf32>
      tpu.vector_store %arg10[%c0_42, %c0_43], %62 {strides = array<i32>} : memref<8x1xf32, #tpu.memory_space<vmem>>, vector<8x1xf32>,
    } else {
    }
    %c0_2 = arith.constant 0 : index
    %c0_3 = arith.constant 0 : index
    %4 = vector.load %arg4[%c0_2, %c0_3] : memref<32x128xf32, #tpu.memory_space<vmem>>, vector<32x128xf32>
    %cst = arith.constant dense<0.000000e+00> : vector<8x128xf32>
    %5 = tpu.matmul %0, %4, %cst {dimension_numbers = #tpu.dot_dimension_numbers<[1], [0], [0], [1], [0, 0, 1, 1], [], []>} : vector<8x32xf32>, vector<32x128xf32>, vector<8x128xf32> -> vector<8x128xf32>
    %c0_4 = arith.constant 0 : index
    %c0_5 = arith.constant 0 : index
    %6 = vector.load %arg11[%c0_4, %c0_5] : memref<8x1xf32, #tpu.memory_space<vmem>>, vector<8x1xf32>
    %7 = vector.broadcast %6 : vector<8x1xf32> to vector<8x128xf32>
    %8 = arith.addf %5, %7 : vector<8x128xf32>
    %c0_6 = arith.constant 0 : index
    %c0_7 = arith.constant 0 : index
    %9 = vector.load %arg5[%c0_6, %c0_7] : memref<1x128xf32, #tpu.memory_space<vmem>>, vector<1x128xf32>
    %10 = vector.broadcast %9 : vector<1x128xf32> to vector<8x128xf32>
    %11 = arith.addf %8, %10 : vector<8x128xf32>
    %c0_8 = arith.constant 0 : index
    %c0_9 = arith.constant 0 : index
    %12 = vector.load %arg6[%c0_8, %c0_9] : memref<8x128xf32, #tpu.memory_space<vmem>>, vector<8x128xf32>
    tpu.vector_store %arg6[%c0_8, %c0_9], %11 {strides = array<i32>} : memref<8x128xf32, #tpu.memory_space<vmem>>, vector<8x128xf32>,
    %c0_10 = arith.constant 0 : index
    %c0_11 = arith.constant 0 : index
    %13 = vector.load %arg3[%c0_10, %c0_11] : memref<8x1xi32, #tpu.memory_space<vmem>>, vector<8x1xi32>
    %c128_i32 = arith.constant 128 : i32
    %14 = arith.muli %arg1, %c128_i32 : i32
    %15 = tpu.iota {dimensions = array<i32: 1>} : vector<8x128xi32>
    %16 = vector.broadcast %14 : i32 to vector<8x128xi32>
    %17 = arith.addi %16, %15 : vector<8x128xi32>
    %18 = vector.broadcast %13 : vector<8x1xi32> to vector<8x128xi32>
    %19 = arith.cmpi eq, %17, %18 : vector<8x128xi32>
    %20 = arith.extui %19 : vector<8x128xi1> to vector<8x128xi32>
    %21 = arith.sitofp %20 : vector<8x128xi32> to vector<8x128xf32>
    %cst_12 = arith.constant 1.000000e-01 : f32
    %22 = vector.broadcast %cst_12 : f32 to vector<8x128xf32>
    %23 = arith.mulf %22, %21 : vector<8x128xf32>
    %cst_13 = arith.constant 1.000000e+00 : f32
    %24 = vector.broadcast %cst_13 : f32 to vector<8x128xf32>
    %25 = arith.addf %24, %23 : vector<8x128xf32>
    %26 = arith.mulf %11, %25 : vector<8x128xf32>
    %c0_14 = arith.constant 0 : index
    %c0_15 = arith.constant 0 : index
    %27 = vector.load %arg8[%c0_14, %c0_15] : memref<8x1xf32, #tpu.memory_space<vmem>>, vector<8x1xf32>
    %cst_16 = arith.constant dense<0xFF800000> : vector<8xf32>
    %28 = vector.multi_reduction <maximumf>, %26, %cst_16 [1] : vector<8x128xf32> to vector<8xf32>
    %29 = vector.shape_cast %28 : vector<8xf32> to vector<8x1xf32>
    %30 = arith.maximumf %27, %29 : vector<8x1xf32>
    %31 = arith.subf %27, %30 : vector<8x1xf32>
    %32 = math.exp %31 : vector<8x1xf32>
    %c0_17 = arith.constant 0 : index
    %c0_18 = arith.constant 0 : index
    %33 = vector.load %arg9[%c0_17, %c0_18] : memref<8x1xf32, #tpu.memory_space<vmem>>, vector<8x1xf32>
    %34 = arith.mulf %32, %33 : vector<8x1xf32>
    %35 = vector.broadcast %30 : vector<8x1xf32> to vector<8x128xf32>
    %36 = arith.subf %26, %35 : vector<8x128xf32>
    %37 = math.exp %36 : vector<8x128xf32>
    %cst_19 = arith.constant dense<0.000000e+00> : vector<8xf32>
    %38 = vector.multi_reduction <add>, %37, %cst_19 [1] : vector<8x128xf32> to vector<8xf32>
    %39 = vector.shape_cast %38 : vector<8xf32> to vector<8x1xf32>
    %40 = arith.addf %34, %39 : vector<8x1xf32>
    %c0_20 = arith.constant 0 : index
    %c0_21 = arith.constant 0 : index
    %41 = vector.load %arg9[%c0_20, %c0_21] : memref<8x1xf32, #tpu.memory_space<vmem>>, vector<8x1xf32>
    tpu.vector_store %arg9[%c0_20, %c0_21], %40 {strides = array<i32>} : memref<8x1xf32, #tpu.memory_space<vmem>>, vector<8x1xf32>,
    %c0_22 = arith.constant 0 : index
    %c0_23 = arith.constant 0 : index
    %42 = vector.load %arg8[%c0_22, %c0_23] : memref<8x1xf32, #tpu.memory_space<vmem>>, vector<8x1xf32>
    tpu.vector_store %arg8[%c0_22, %c0_23], %30 {strides = array<i32>} : memref<8x1xf32, #tpu.memory_space<vmem>>, vector<8x1xf32>,
    %c0_24 = arith.constant 0 : index
    %c0_25 = arith.constant 0 : index
    %43 = vector.load %arg10[%c0_24, %c0_25] : memref<8x1xf32, #tpu.memory_space<vmem>>, vector<8x1xf32>
    %44 = arith.mulf %21, %11 : vector<8x128xf32>
    %cst_26 = arith.constant dense<0.000000e+00> : vector<8xf32>
    %45 = vector.multi_reduction <add>, %44, %cst_26 [1] : vector<8x128xf32> to vector<8xf32>
    %46 = vector.shape_cast %45 : vector<8xf32> to vector<8x1xf32>
    %47 = arith.addf %43, %46 : vector<8x1xf32>
    %c0_27 = arith.constant 0 : index
    %c0_28 = arith.constant 0 : index
    %48 = vector.load %arg10[%c0_27, %c0_28] : memref<8x1xf32, #tpu.memory_space<vmem>>, vector<8x1xf32>
    tpu.vector_store %arg10[%c0_27, %c0_28], %47 {strides = array<i32>} : memref<8x1xf32, #tpu.memory_space<vmem>>, vector<8x1xf32>,
    %c0_i32_29 = arith.constant 0 : i32
    %49 = arith.cmpi eq, %arg1, %c0_i32_29 : i32
    %50 = arith.extui %49 : i1 to i32
    %c0_i32_30 = arith.constant 0 : i32
    %51 = arith.cmpi ne, %50, %c0_i32_30 : i32
    scf.if %51 {
      %c0_31 = arith.constant 0 : index
      %c0_32 = arith.constant 0 : index
      %52 = vector.load %arg8[%c0_31, %c0_32] : memref<8x1xf32, #tpu.memory_space<vmem>>, vector<8x1xf32>
      %c0_33 = arith.constant 0 : index
      %c0_34 = arith.constant 0 : index
      %53 = vector.load %arg9[%c0_33, %c0_34] : memref<8x1xf32, #tpu.memory_space<vmem>>, vector<8x1xf32>
      %54 = math.log %53 : vector<8x1xf32>
      %55 = arith.addf %52, %54 : vector<8x1xf32>
      %c0_35 = arith.constant 0 : index
      %c0_36 = arith.constant 0 : index
      %56 = vector.load %arg10[%c0_35, %c0_36] : memref<8x1xf32, #tpu.memory_space<vmem>>, vector<8x1xf32>
      %cst_37 = arith.constant 1.100000e+00 : f32
      %57 = vector.broadcast %cst_37 : f32 to vector<8x1xf32>
      %58 = arith.mulf %56, %57 : vector<8x1xf32>
      %c8_i32 = arith.constant 8 : i32
      %59 = arith.muli %arg0, %c8_i32 : i32
      %60 = tpu.iota {dimensions = array<i32: 0>} : vector<8x1xi32>
      %61 = vector.broadcast %59 : i32 to vector<8x1xi32>
      %62 = arith.addi %61, %60 : vector<8x1xi32>
      %c8_i32_38 = arith.constant 8 : i32
      %63 = vector.broadcast %c8_i32_38 : i32 to vector<8x1xi32>
      %64 = arith.cmpi slt, %62, %63 : vector<8x1xi32>
      %65 = arith.subf %55, %58 : vector<8x1xf32>
      %cst_39 = arith.constant 0.000000e+00 : f32
      %66 = vector.broadcast %cst_39 : f32 to vector<8x1xf32>
      %67 = arith.select %64, %65, %66 : vector<8x1xi1>, vector<8x1xf32>
      %68 = vector.shape_cast %67 : vector<8x1xf32> to vector<1x8x1xf32>
      %cst_40 = arith.constant dense<0.000000e+00> : vector<1xf32>
      %69 = vector.multi_reduction <add>, %68, %cst_40 [1, 2] : vector<1x8x1xf32> to vector<1xf32>
      %70 = vector.shape_cast %69 : vector<1xf32> to vector<1x1x1xf32>
      %71 = vector.extract %70[0, 0, 0] : f32 from vector<1x1x1xf32>
      %cst_41 = arith.constant 0.000000e+00 : f32
      %72 = vector.broadcast %cst_41 : f32 to vector<8x1xf32>
      %73 = arith.subf %72, %56 : vector<8x1xf32>
      %cst_42 = arith.constant 0.000000e+00 : f32
      %74 = vector.broadcast %cst_42 : f32 to vector<8x1xf32>
      %75 = arith.select %64, %73, %74 : vector<8x1xi1>, vector<8x1xf32>
      %76 = vector.shape_cast %75 : vector<8x1xf32> to vector<1x8x1xf32>
      %cst_43 = arith.constant dense<0.000000e+00> : vector<1xf32>
      %77 = vector.multi_reduction <add>, %76, %cst_43 [1, 2] : vector<1x8x1xf32> to vector<1xf32>
      %78 = vector.shape_cast %77 : vector<1xf32> to vector<1x1x1xf32>
      %79 = vector.extract %78[0, 0, 0] : f32 from vector<1x1x1xf32>
      %80 = tpu.iota {dimensions = array<i32: 0>} : vector<8x128xi32>
      %81 = tpu.iota {dimensions = array<i32: 1>} : vector<8x128xi32>
      %c0_i32_44 = arith.constant 0 : i32
      %82 = vector.broadcast %c0_i32_44 : i32 to vector<8x128xi32>
      %83 = arith.cmpi eq, %80, %82 : vector<8x128xi32>
      %c0_i32_45 = arith.constant 0 : i32
      %84 = vector.broadcast %c0_i32_45 : i32 to vector<8x128xi32>
      %85 = arith.cmpi eq, %81, %84 : vector<8x128xi32>
      %86 = arith.andi %83, %85 : vector<8x128xi1>
      %c0_i32_46 = arith.constant 0 : i32
      %87 = vector.broadcast %c0_i32_46 : i32 to vector<8x128xi32>
      %88 = arith.cmpi eq, %80, %87 : vector<8x128xi32>
      %c1_i32 = arith.constant 1 : i32
      %89 = vector.broadcast %c1_i32 : i32 to vector<8x128xi32>
      %90 = arith.cmpi eq, %81, %89 : vector<8x128xi32>
      %91 = arith.andi %88, %90 : vector<8x128xi1>
      %cst_47 = arith.constant 0.000000e+00 : f32
      %92 = vector.broadcast %79 : f32 to vector<8x128xf32>
      %93 = vector.broadcast %cst_47 : f32 to vector<8x128xf32>
      %94 = arith.select %91, %92, %93 : vector<8x128xi1>, vector<8x128xf32>
      %95 = vector.broadcast %71 : f32 to vector<8x128xf32>
      %96 = arith.select %86, %95, %94 : vector<8x128xi1>, vector<8x128xf32>
      %c0_48 = arith.constant 0 : index
      %c0_49 = arith.constant 0 : index
      %97 = vector.load %arg7[%c0_48, %c0_49] : memref<8x128xf32, #tpu.memory_space<vmem>>, vector<8x128xf32>
      tpu.vector_store %arg7[%c0_48, %c0_49], %96 {strides = array<i32>} : memref<8x128xf32, #tpu.memory_space<vmem>>, vector<8x128xf32>,
    } else {
    }
    return
  }
  func.func @transform_0(%arg0: i32, %arg1: i32) -> (i32, i32) {
    %c0_i32 = arith.constant 0 : i32
    %c0_i32_0 = arith.constant 0 : i32
    return %arg0, %c0_i32 : i32, i32
  }
  func.func @transform_1(%arg0: i32, %arg1: i32) -> (i32, i32) {
    %c0_i32 = arith.constant 0 : i32
    %c0_i32_0 = arith.constant 0 : i32
    return %arg0, %c0_i32 : i32, i32
  }
  func.func @transform_2(%arg0: i32, %arg1: i32) -> (i32, i32) {
    %c0_i32 = arith.constant 0 : i32
    %c0_i32_0 = arith.constant 0 : i32
    return %c0_i32, %arg1 : i32, i32
  }
  func.func @transform_3(%arg0: i32, %arg1: i32) -> (i32, i32) {
    %c0_i32 = arith.constant 0 : i32
    %c0_i32_0 = arith.constant 0 : i32
    return %c0_i32, %arg1 : i32, i32
  }
  func.func @transform_4(%arg0: i32, %arg1: i32) -> (i32, i32) {
    %c0_i32 = arith.constant 0 : i32
    return %arg0, %arg1 : i32, i32
  }
  func.func @transform_5(%arg0: i32, %arg1: i32) -> (i32, i32) {
    %c0_i32 = arith.constant 0 : i32
    %c0_i32_0 = arith.constant 0 : i32
    return %arg0, %c0_i32 : i32, i32
  }
}

</mosaic_0001>

<bundles_post_ra>
// kernel: tpu_custom_call.1
= control target key start
LH: loop header
LB: loop body
LE: loop exit
PB: predicated region body
PF: predicated region fallthrough
CT: control target
= control target key end

     0   :  { %11 = vsyncpa [#allocation7], 0  ;;  %s446_s0 = inlined_call_operand.vmem [shape: f32[8,32], index: 0, kind: input, shape index: {}]   ;;  %s447_s1 = inlined_call_operand.vmem [shape: s32[8,1], index: 1, kind: input, shape index: {}]   ;;  %s448_s2 = inlined_call_operand.hbm [shape: f32[32,128], index: 2, kind: input, shape index: {}]   ;;  %s449_s3 = inlined_call_operand.vmem [shape: f32[1,128], index: 3, kind: input, shape index: {}]   ;;  %s450_s4 = inlined_call_operand.hbm [shape: f32[8,128], index: 4, kind: output, shape index: {0}]   ;;  %s451_s5 = inlined_call_operand.hbm [shape: f32[8,128], index: 5, kind: output, shape index: {1}]  }
   0x1   :  { %12 = vsyncpa [#allocation8], 0 }
   0x2   :  { %13 = vsyncpa [#allocation11], 0  ;;  %s373_s18 = smov [#allocation6]  }
   0x3   :  { %s23_s19 = sshll.u32 %s373_s18, 4  ;;  %s24_s19 = int_to_ptr.vmem [resolvable:$true] %s23_s19 }
   0x4   :  { %s315_s20 = scalar_lea.vmem %s24_s19, 512  ;;  %p320_p1 = scmp.lt.s32.totalorder %s24_s19, %s24_s19 }
   0x5   :  { %p316_p0 = scmp.ne.s32.totalorder %s24_s19, %s315_s20  ;;  %p321_p2 = scmp.lt.s32.totalorder %s315_s20, %s315_s20 }
   0x7   :  { %p322_p3 = por %p321_p2, %p320_p1 }
   0x9   :  { %p323_p4 = pnand %p322_p3, %p316_p0 }
   0xb   :  { %326 = shalt.err (!%p323_p4)
}
   0xc   :  { %s374_s21 = smov 128   ;;  %s375_s22 = smov 8  }
   0xd   :  { %29 = dma.hbm_to_vmem [thread:$0]  %s448_s2, 512, %s24_s19, [#allocation7], %s374_s21, %s374_s21, %s375_s22  }
   0xe   :  { %367 = dma.done.wait [#allocation7], 512  }
   0xf   :  { %368 = vsyncadd [#allocation7], 4294966784  ;;  %vm46_vm0 = vcmask 7168   ;;  %v376_v0 = vmov 0.0   ;;  %vm377_vm1 = vmmov 0   ;;  %v35_v1 = vld [vmem:[%s446_s0] sm:$0xff]  ;;  %v146_v16 = vlaneseq }
  0x10   :  { %275 = vmatprep.subr.mxu0 %v376_v0  ;;  %283 = vmatprep.mubr.msk.f32.mxu0 %vm377_vm1, %v376_v0  ;;  %49 = vst.msk [vmem:[#allocation3] sm:$0xff] %vm46_vm0, %v376_v0  ;;  %50 = vst.msk [vmem:[#allocation4] sm:$0xff] %vm46_vm0, %v376_v0  ;;  %vm41_vm2 = vcmask 261120   ;;  %v54_v2 = vld [vmem:[#allocation6 + $0x18] sm:$0xff]  ;;  %v53_v3 = vld [vmem:[#allocation6 + $0x10] sm:$0xff]  ;;  %v40_v4 = vmul.f32 %v35_v1, %v35_v1  ;;  %v378_v8 = vmov 0  }
  0x11   :  { %276 = vmatpush3.msra.mxu0 %v54_v2  ;;  %v52_v5 = vld [vmem:[#allocation6 + $0x8] sm:$0xff]  ;;  %v51_v7 = vld [vmem:[#allocation6] sm:$0xff]  ;;  %299 = vset.pattern.permute.xlu0 %v378_v8  ;;  %v379_v13 = vmov -inf   ;;  %v426_v17 = vand.u32 127, %v146_v16 }
  0x12   :  { %277 = vmatprep.subr.mxu0 %v376_v0  ;;  %v42_v6 = vsel %vm41_vm2, %v40_v4, 0.0  ;;  %300 = vset.pattern.permute.xlu1 %v378_v8  ;;  %v144_v9 = vld [vmem:[%s447_s1] sm:$0xff]  ;;  %48 = vst.msk [vmem:[#allocation2] sm:$0xff] %vm46_vm0, %v379_v13 }
  0x13   :  { %278 = vmatpush3.msra.mxu0 %v53_v3  ;;  %43 = vadd.xlane.f32.xlu0 %v42_v6  ;;  %v268_v21 = vld [vmem:[%s449_s3] ss:$0 sm:$0xff]  ;;  %s380_s3 = smov [#allocation9]  }
  0x14   :  { %279 = vmatprep.subr.mxu0 %v376_v0  ;;  %s244_s28 = sshll.u32 %s380_s3, 4  ;;  %s245_s28 = int_to_ptr.vmem [resolvable:$true] %s244_s28 }
  0x15   :  { %280 = vmatpush3.msra.mxu0 %v52_v5  ;;  %s327_s29 = scalar_lea.vmem %s245_s28, 128  ;;  %p332_p6 = scmp.lt.s32.totalorder %s245_s28, %s245_s28 }
  0x16   :  { %281 = vmatprep.subr.mxu0 %v376_v0  ;;  %p328_p5 = scmp.ne.s32.totalorder %s245_s28, %s327_s29  ;;  %p333_p7 = scmp.lt.s32.totalorder %s327_s29, %s327_s29 }
  0x17   :  { %282 = vmatpush3.msra.mxu0 %v51_v7  ;;  %v182_v36 = vld [vmem:[#allocation4] sm:$0xff]  ;;  %v166_v41 = vld [vmem:[#allocation3] sm:$0xff] }
  0x18   :  { %284 = vmatmul.mubr.msk.f32.vlgmr.msra.gmra.mxu0 %vm41_vm2, %v35_v1  ;;  %p334_p8 = por %p333_p7, %p332_p6 }
  0x19   :  { %v159_v27 = vld [vmem:[#allocation2] sm:$0xff] }
  0x1a   :  { %p335_p9 = pnand %p334_p8, %p328_p5 }
  0x29   :  { %151 = vperm.xlu0 %299, %v144_v9  }
  0x9c   :  { %v44_v10 = vpop.xlane.xlu0 %43 }
  0x9d   :  { %v45_v11 = vmul.f32 -0.5, %v44_v10 }
  0x9f   :  { %47 = vst.msk [vmem:[#allocation5] sm:$0xff] %vm46_vm0, %v45_v11 }
  0xa4   :  { %v152_v18 = vpop.permute.xlu0 %151 }
  0xa5   :  { %vm153_vm3 = vcmp.eq.s32.totalorder %v426_v17, %v152_v18 }
  0xa6   :  { %v55_v12 = vld [vmem:[#allocation5] sm:$0xff]  ;;  %v269_v19 = vsel %vm153_vm3, 1.0, %v376_v0 }
  0xa7   :  { %58 = vperm.xlu1 %300, %v55_v12   ;;  %v156_v20 = vmul.f32 0.1, %v269_v19 }
  0xa9   :  { %v157_v23 = vadd.f32 1.0, %v156_v20 }
  0xd8   :  { %v131_v14 = vpop.f32.mrf.mxu0 }
  0xda   :  { %v285_v15 = vpop.f32.mrf.mxu0 }
 0x122   :  { %v59_v22 = vpop.permute.xlu1 %58 }
 0x123   :  { %v132_v24 = vadd.f32 %v131_v14, %v59_v22 }
 0x125   :  { %v142_v25 = vadd.f32 %v268_v21, %v132_v24 }
 0x127   :  { %143 = vst [vmem:[#allocation9] sm:$0xff] %v142_v25  ;;  %v158_v26 = vmul.f32 %v157_v23, %v142_v25  ;;  %v183_v31 = vmul.f32 %v269_v19, %v142_v25 }
 0x129   :  { %160 = vmax.xlane.f32.xlu1 %v158_v26 }
 0x1b2   :  { %v161_v28 = vpop.xlane.xlu1 %160 }
 0x1b3   :  { %v162_v29 = vmax.f32 %v159_v27, %v161_v28 }
 0x1b5   :  { %v163_v30 = vsub.f32 %v159_v27, %v162_v29  ;;  %181 = vst.msk [vmem:[#allocation2] sm:$0xff] %vm46_vm0, %v162_v29  ;;  %170 = vperm.xlu1 %300, %v162_v29  }
 0x1b7   :  { %v164_v39 = vmul.f32 1.442695, %v163_v30 }
 0x1bc   :  { %v191_v49 = vld [vmem:[#allocation2] sm:$0xff] }
 0x1d9   :  { %184 = vadd.xlane.f32.xlu1 %v183_v31 }
 0x230   :  { %v171_v32 = vpop.permute.xlu1 %170 }
 0x231   :  { %v173_v33 = vsub.f32 %v158_v26, %v171_v32 }
 0x233   :  { %v174_v34 = vmul.f32 1.442695, %v173_v33 }
 0x235   :  { %301 = vpow2.f32 %v174_v34 }
 0x236   :  { %303 = vpow2.f32 %v164_v39 }
 0x242   :  { %v302_v35 = vpop.eup %301 }
 0x243   :  { %176 = vadd.xlane.f32.xlu0 %v302_v35  ;;  %v304_v40 = vpop.eup %303 }
 0x244   :  { %v167_v42 = vmul.f32 %v304_v40, %v166_v41 }
 0x262   :  { %v185_v37 = vpop.xlane.xlu1 %184 }
 0x263   :  { %v186_v38 = vadd.f32 %v185_v37, %v182_v36 }
 0x265   :  { %187 = vst.msk [vmem:[#allocation4] sm:$0xff] %vm46_vm0, %v186_v38 }
 0x26c   :  { %v196_v47 = vld [vmem:[#allocation4] sm:$0xff] }
 0x26d   :  { %v197_v51 = vmul.f32 1.1, %v196_v47  ;;  %v216_v54 = vsub.f32 0.0, %v196_v47 }
 0x26f   :  { %v218_v55 = vsel %vm46_vm0, %v216_v54, 0.0 }
 0x2cc   :  { %v177_v43 = vpop.xlane.xlu0 %176 }
 0x2cd   :  { %v178_v44 = vadd.f32 %v177_v43, %v167_v42 }
 0x2cf   :  { %180 = vst.msk [vmem:[#allocation3] sm:$0xff] %vm46_vm0, %v178_v44 }
 0x2d6   :  { %v192_v45 = vld [vmem:[#allocation3] sm:$0xff] }
 0x2d7   :  { %305 = vlog2.f32 %v192_v45 }
 0x2e4   :  { %v306_v46 = vpop.eup %305 }
 0x2e5   :  { %v194_v48 = vmul.f32 0.6931472, %v306_v46 }
 0x2e7   :  { %v195_v50 = vadd.f32 %v194_v48, %v191_v49 }
 0x2e9   :  { %v204_v52 = vsub.f32 %v195_v50, %v197_v51 }
 0x2eb   :  { %v206_v53 = vsel %vm46_vm0, %v204_v52, 0.0 }
 0x2ec   :  { %207 = vadd.xlane.f32.xlu0 %v206_v53 }
 0x2f0   :  { %219 = vadd.xlane.f32.xlu0 %v218_v55 }
 0x2f1   :  { %338 = shalt.err (!%p335_p9)
}
 0x2f2   :  { %247 = dma.vmem_to_hbm [thread:$0]  %s245_s28, 128, %s450_s4, [#allocation8]   ;;  %v200_v6 = vshrl.u32 %v146_v16, 7  ;;  %vm231_vm5 = vcmp.eq.s32.totalorder %v426_v17, 1  ;;  %vm229_vm6 = vcmp.eq.s32.totalorder %v426_v17, 0 }
 0x2f3   :  { %s381_s7 = smov [#allocation10]  }
 0x2f4   :  { %vm228_vm4 = vcmp.eq.s32.totalorder %v200_v6, 0  ;;  %s254_s8 = sshll.u32 %s381_s7, 4  ;;  %s255_s8 = int_to_ptr.vmem [resolvable:$true] %s254_s8 }
 0x2f5   :  { %vm232_vm7 = vmand %vm228_vm4, %vm231_vm5  ;;  %s347_s10 = scalar_lea.vmem %s255_s8, 128  ;;  %p352_p11 = scmp.lt.s32.totalorder %s255_s8, %s255_s8 }
 0x2f6   :  { %vm230_vm8 = vmand %vm228_vm4, %vm229_vm6  ;;  %p348_p10 = scmp.ne.s32.totalorder %s255_s8, %s347_s10  ;;  %p353_p12 = scmp.lt.s32.totalorder %s347_s10, %s347_s10 }
 0x2f8   :  { %p354_p13 = por %p353_p12, %p352_p11 }
 0x2fa   :  { %p355_p0 = pnand %p354_p13, %p348_p10 }
 0x375   :  { %v208_v56 = vpop.xlane.xlu0 %207 }
 0x376   :  { %v209_v57 = vrot.slane %v208_v56, 4 }
 0x378   :  { %v210_v58 = vadd.f32 %v209_v57, %v208_v56 }
 0x379   :  { %v220_v59 = vpop.xlane.xlu0 %219 }
 0x37a   :  { %v211_v60 = vrot.slane %v210_v58, 2  ;;  %v221_v61 = vrot.slane %v220_v59, 4 }
 0x37c   :  { %v222_v62 = vadd.f32 %v221_v61, %v220_v59  ;;  %v212_v63 = vadd.f32 %v211_v60, %v210_v58 }
 0x37e   :  { %v223_v0 = vrot.slane %v222_v62, 2  ;;  %v213_v1 = vrot.slane %v212_v63, 1 }
 0x380   :  { %v224_v2 = vadd.f32 %v223_v0, %v222_v62  ;;  %v214_v3 = vadd.f32 %v213_v1, %v212_v63 }
 0x382   :  { %286 = vpush %v214_v3  ;;  %v225_v4 = vrot.slane %v224_v2, 1 }
 0x384   :  { %v226_v5 = vadd.f32 %v225_v4, %v224_v2 }
 0x386   :  { %288 = vpush %v226_v5 }
 0x3b3   :  { %s287_s4 = spop %286 }
 0x3b4   :  { %v235_v8 = vstv %s287_s4 }
 0x3b7   :  { %s289_s9 = spop %288 }
 0x3b8   :  { %v233_v7 = vstv %s289_s9 }
 0x3b9   :  { %v234_v9 = vsel %vm232_vm7, %v233_v7, 0.0 }
 0x3ba   :  { %v236_v10 = vsel %vm230_vm8, %v235_v8, %v234_v9 }
 0x3bb   :  { %237 = vst [vmem:[#allocation10] sm:$0xff] %v236_v10 }
 0x3bc   :  { %358 = shalt.err (!%p355_p0)
}
 0x3bd   :  { %257 = dma.vmem_to_hbm [thread:$0]  %s255_s8, 128, %s451_s5, [#allocation11]  }
 0x3be   :  { %369 = dma.done.wait [#allocation8], 128  }
 0x3bf   :  { %370 = vsyncadd [#allocation8], 4294967168 }
 0x3c0   :  { %371 = dma.done.wait [#allocation11], 128  }
 0x3c1   :  { %372 = vsyncadd [#allocation11], 4294967168 }
 0x3c2   :  { %264 = vsyncpa [#allocation7], 1 }
 0x3c3   :  { %265 = vsyncpa [#allocation8], 1 }
 0x3c4   :  { %266 = vsyncpa [#allocation11], 1 }

// kernel: tpu_custom_call.1
= control target key start
LH: loop header
LB: loop body
LE: loop exit
PB: predicated region body
PF: predicated region fallthrough
CT: control target
= control target key end

     0   :  { %11 = vsyncpa [#allocation7], 0  ;;  %s446_s0 = inlined_call_operand.vmem [shape: f32[8,32], index: 0, kind: input, shape index: {}]   ;;  %s447_s1 = inlined_call_operand.vmem [shape: s32[8,1], index: 1, kind: input, shape index: {}]   ;;  %s448_s2 = inlined_call_operand.hbm [shape: f32[32,128], index: 2, kind: input, shape index: {}]   ;;  %s449_s3 = inlined_call_operand.vmem [shape: f32[1,128], index: 3, kind: input, shape index: {}]   ;;  %s450_s4 = inlined_call_operand.hbm [shape: f32[8,128], index: 4, kind: output, shape index: {0}]   ;;  %s451_s5 = inlined_call_operand.hbm [shape: f32[8,128], index: 5, kind: output, shape index: {1}]  }
   0x1   :  { %12 = vsyncpa [#allocation8], 0 }
   0x2   :  { %13 = vsyncpa [#allocation11], 0  ;;  %s373_s18 = smov [#allocation6]  }
   0x3   :  { %s23_s19 = sshll.u32 %s373_s18, 4  ;;  %s24_s19 = int_to_ptr.vmem [resolvable:$true] %s23_s19 }
   0x4   :  { %s315_s20 = scalar_lea.vmem %s24_s19, 512  ;;  %p320_p1 = scmp.lt.s32.totalorder %s24_s19, %s24_s19 }
   0x5   :  { %p316_p0 = scmp.ne.s32.totalorder %s24_s19, %s315_s20  ;;  %p321_p2 = scmp.lt.s32.totalorder %s315_s20, %s315_s20 }
   0x7   :  { %p322_p3 = por %p321_p2, %p320_p1 }
   0x9   :  { %p323_p4 = pnand %p322_p3, %p316_p0 }
   0xb   :  { %326 = shalt.err (!%p323_p4)
}
   0xc   :  { %s374_s21 = smov 128   ;;  %s375_s22 = smov 8  }
   0xd   :  { %29 = dma.hbm_to_vmem [thread:$0]  %s448_s2, 512, %s24_s19, [#allocation7], %s374_s21, %s374_s21, %s375_s22  }
   0xe   :  { %367 = dma.done.wait [#allocation7], 512  }
   0xf   :  { %368 = vsyncadd [#allocation7], 4294966784  ;;  %vm46_vm0 = vcmask 7168   ;;  %v376_v0 = vmov 0.0   ;;  %vm377_vm1 = vmmov 0   ;;  %v35_v1 = vld [vmem:[%s446_s0] sm:$0xff]  ;;  %v146_v16 = vlaneseq }
  0x10   :  { %275 = vmatprep.subr.mxu0 %v376_v0  ;;  %283 = vmatprep.mubr.msk.f32.mxu0 %vm377_vm1, %v376_v0  ;;  %49 = vst.msk [vmem:[#allocation3] sm:$0xff] %vm46_vm0, %v376_v0  ;;  %50 = vst.msk [vmem:[#allocation4] sm:$0xff] %vm46_vm0, %v376_v0  ;;  %vm41_vm2 = vcmask 261120   ;;  %v54_v2 = vld [vmem:[#allocation6 + $0x18] sm:$0xff]  ;;  %v53_v3 = vld [vmem:[#allocation6 + $0x10] sm:$0xff]  ;;  %v40_v4 = vmul.f32 %v35_v1, %v35_v1  ;;  %v378_v8 = vmov 0  }
  0x11   :  { %276 = vmatpush3.msra.mxu0 %v54_v2  ;;  %v52_v5 = vld [vmem:[#allocation6 + $0x8] sm:$0xff]  ;;  %v51_v7 = vld [vmem:[#allocation6] sm:$0xff]  ;;  %299 = vset.pattern.permute.xlu0 %v378_v8  ;;  %v379_v13 = vmov -inf   ;;  %v426_v17 = vand.u32 127, %v146_v16 }
  0x12   :  { %277 = vmatprep.subr.mxu0 %v376_v0  ;;  %v42_v6 = vsel %vm41_vm2, %v40_v4, 0.0  ;;  %300 = vset.pattern.permute.xlu1 %v378_v8  ;;  %v144_v9 = vld [vmem:[%s447_s1] sm:$0xff]  ;;  %48 = vst.msk [vmem:[#allocation2] sm:$0xff] %vm46_vm0, %v379_v13 }
  0x13   :  { %278 = vmatpush3.msra.mxu0 %v53_v3  ;;  %43 = vadd.xlane.f32.xlu0 %v42_v6  ;;  %v268_v21 = vld [vmem:[%s449_s3] ss:$0 sm:$0xff]  ;;  %s380_s3 = smov [#allocation9]  }
  0x14   :  { %279 = vmatprep.subr.mxu0 %v376_v0  ;;  %s244_s28 = sshll.u32 %s380_s3, 4  ;;  %s245_s28 = int_to_ptr.vmem [resolvable:$true] %s244_s28 }
  0x15   :  { %280 = vmatpush3.msra.mxu0 %v52_v5  ;;  %s327_s29 = scalar_lea.vmem %s245_s28, 128  ;;  %p332_p6 = scmp.lt.s32.totalorder %s245_s28, %s245_s28 }
  0x16   :  { %281 = vmatprep.subr.mxu0 %v376_v0  ;;  %p328_p5 = scmp.ne.s32.totalorder %s245_s28, %s327_s29  ;;  %p333_p7 = scmp.lt.s32.totalorder %s327_s29, %s327_s29 }
  0x17   :  { %282 = vmatpush3.msra.mxu0 %v51_v7  ;;  %v182_v36 = vld [vmem:[#allocation4] sm:$0xff]  ;;  %v166_v41 = vld [vmem:[#allocation3] sm:$0xff] }
  0x18   :  { %284 = vmatmul.mubr.msk.f32.vlgmr.msra.gmra.mxu0 %vm41_vm2, %v35_v1  ;;  %p334_p8 = por %p333_p7, %p332_p6 }
  0x19   :  { %v159_v27 = vld [vmem:[#allocation2] sm:$0xff] }
  0x1a   :  { %p335_p9 = pnand %p334_p8, %p328_p5 }
  0x29   :  { %151 = vperm.xlu0 %299, %v144_v9  }
  0x9c   :  { %v44_v10 = vpop.xlane.xlu0 %43 }
  0x9d   :  { %v45_v11 = vmul.f32 -0.5, %v44_v10 }
  0x9f   :  { %47 = vst.msk [vmem:[#allocation5] sm:$0xff] %vm46_vm0, %v45_v11 }
  0xa4   :  { %v152_v18 = vpop.permute.xlu0 %151 }
  0xa5   :  { %vm153_vm3 = vcmp.eq.s32.totalorder %v426_v17, %v152_v18 }
  0xa6   :  { %v55_v12 = vld [vmem:[#allocation5] sm:$0xff]  ;;  %v269_v19 = vsel %vm153_vm3, 1.0, %v376_v0 }
  0xa7   :  { %58 = vperm.xlu1 %300, %v55_v12   ;;  %v156_v20 = vmul.f32 0.1, %v269_v19 }
  0xa9   :  { %v157_v23 = vadd.f32 1.0, %v156_v20 }
  0xd8   :  { %v131_v14 = vpop.f32.mrf.mxu0 }
  0xda   :  { %v285_v15 = vpop.f32.mrf.mxu0 }
 0x122   :  { %v59_v22 = vpop.permute.xlu1 %58 }
 0x123   :  { %v132_v24 = vadd.f32 %v131_v14, %v59_v22 }
 0x125   :  { %v142_v25 = vadd.f32 %v268_v21, %v132_v24 }
 0x127   :  { %143 = vst [vmem:[#allocation9] sm:$0xff] %v142_v25  ;;  %v158_v26 = vmul.f32 %v157_v23, %v142_v25  ;;  %v183_v31 = vmul.f32 %v269_v19, %v142_v25 }
 0x129   :  { %160 = vmax.xlane.f32.xlu1 %v158_v26 }
 0x1b2   :  { %v161_v28 = vpop.xlane.xlu1 %160 }
 0x1b3   :  { %v162_v29 = vmax.f32 %v159_v27, %v161_v28 }
 0x1b5   :  { %v163_v30 = vsub.f32 %v159_v27, %v162_v29  ;;  %181 = vst.msk [vmem:[#allocation2] sm:$0xff] %vm46_vm0, %v162_v29  ;;  %170 = vperm.xlu1 %300, %v162_v29  }
 0x1b7   :  { %v164_v39 = vmul.f32 1.442695, %v163_v30 }
 0x1bc   :  { %v191_v49 = vld [vmem:[#allocation2] sm:$0xff] }
 0x1d9   :  { %184 = vadd.xlane.f32.xlu1 %v183_v31 }
 0x230   :  { %v171_v32 = vpop.permute.xlu1 %170 }
 0x231   :  { %v173_v33 = vsub.f32 %v158_v26, %v171_v32 }
 0x233   :  { %v174_v34 = vmul.f32 1.442695, %v173_v33 }
 0x235   :  { %301 = vpow2.f32 %v174_v34 }
 0x236   :  { %303 = vpow2.f32 %v164_v39 }
 0x242   :  { %v302_v35 = vpop.eup %301 }
 0x243   :  { %176 = vadd.xlane.f32.xlu0 %v302_v35  ;;  %v304_v40 = vpop.eup %303 }
 0x244   :  { %v167_v42 = vmul.f32 %v304_v40, %v166_v41 }
 0x262   :  { %v185_v37 = vpop.xlane.xlu1 %184 }
 0x263   :  { %v186_v38 = vadd.f32 %v185_v37, %v182_v36 }
 0x265   :  { %187 = vst.msk [vmem:[#allocation4] sm:$0xff] %vm46_vm0, %v186_v38 }
 0x26c   :  { %v196_v47 = vld [vmem:[#allocation4] sm:$0xff] }
 0x26d   :  { %v197_v51 = vmul.f32 1.1, %v196_v47  ;;  %v216_v54 = vsub.f32 0.0, %v196_v47 }
 0x26f   :  { %v218_v55 = vsel %vm46_vm0, %v216_v54, 0.0 }
 0x2cc   :  { %v177_v43 = vpop.xlane.xlu0 %176 }
 0x2cd   :  { %v178_v44 = vadd.f32 %v177_v43, %v167_v42 }
 0x2cf   :  { %180 = vst.msk [vmem:[#allocation3] sm:$0xff] %vm46_vm0, %v178_v44 }
 0x2d6   :  { %v192_v45 = vld [vmem:[#allocation3] sm:$0xff] }
 0x2d7   :  { %305 = vlog2.f32 %v192_v45 }
 0x2e4   :  { %v306_v46 = vpop.eup %305 }
 0x2e5   :  { %v194_v48 = vmul.f32 0.6931472, %v306_v46 }
 0x2e7   :  { %v195_v50 = vadd.f32 %v194_v48, %v191_v49 }
 0x2e9   :  { %v204_v52 = vsub.f32 %v195_v50, %v197_v51 }
 0x2eb   :  { %v206_v53 = vsel %vm46_vm0, %v204_v52, 0.0 }
 0x2ec   :  { %207 = vadd.xlane.f32.xlu0 %v206_v53 }
 0x2f0   :  { %219 = vadd.xlane.f32.xlu0 %v218_v55 }
 0x2f1   :  { %338 = shalt.err (!%p335_p9)
}
 0x2f2   :  { %247 = dma.vmem_to_hbm [thread:$0]  %s245_s28, 128, %s450_s4, [#allocation8]   ;;  %v200_v6 = vshrl.u32 %v146_v16, 7  ;;  %vm231_vm5 = vcmp.eq.s32.totalorder %v426_v17, 1  ;;  %vm229_vm6 = vcmp.eq.s32.totalorder %v426_v17, 0 }
 0x2f3   :  { %s381_s7 = smov [#allocation10]  }
 0x2f4   :  { %vm228_vm4 = vcmp.eq.s32.totalorder %v200_v6, 0  ;;  %s254_s8 = sshll.u32 %s381_s7, 4  ;;  %s255_s8 = int_to_ptr.vmem [resolvable:$true] %s254_s8 }
 0x2f5   :  { %vm232_vm7 = vmand %vm228_vm4, %vm231_vm5  ;;  %s347_s10 = scalar_lea.vmem %s255_s8, 128  ;;  %p352_p11 = scmp.lt.s32.totalorder %s255_s8, %s255_s8 }
 0x2f6   :  { %vm230_vm8 = vmand %vm228_vm4, %vm229_vm6  ;;  %p348_p10 = scmp.ne.s32.totalorder %s255_s8, %s347_s10  ;;  %p353_p12 = scmp.lt.s32.totalorder %s347_s10, %s347_s10 }
 0x2f8   :  { %p354_p13 = por %p353_p12, %p352_p11 }
 0x2fa   :  { %p355_p0 = pnand %p354_p13, %p348_p10 }
 0x375   :  { %v208_v56 = vpop.xlane.xlu0 %207 }
 0x376   :  { %v209_v57 = vrot.slane %v208_v56, 4 }
 0x378   :  { %v210_v58 = vadd.f32 %v209_v57, %v208_v56 }
 0x379   :  { %v220_v59 = vpop.xlane.xlu0 %219 }
 0x37a   :  { %v211_v60 = vrot.slane %v210_v58, 2  ;;  %v221_v61 = vrot.slane %v220_v59, 4 }
 0x37c   :  { %v222_v62 = vadd.f32 %v221_v61, %v220_v59  ;;  %v212_v63 = vadd.f32 %v211_v60, %v210_v58 }
 0x37e   :  { %v223_v0 = vrot.slane %v222_v62, 2  ;;  %v213_v1 = vrot.slane %v212_v63, 1 }
 0x380   :  { %v224_v2 = vadd.f32 %v223_v0, %v222_v62  ;;  %v214_v3 = vadd.f32 %v213_v1, %v212_v63 }
 0x382   :  { %286 = vpush %v214_v3  ;;  %v225_v4 = vrot.slane %v224_v2, 1 }
 0x384   :  { %v226_v5 = vadd.f32 %v225_v4, %v224_v2 }
 0x386   :  { %288 = vpush %v226_v5 }
 0x3b3   :  { %s287_s4 = spop %286 }
 0x3b4   :  { %v235_v8 = vstv %s287_s4 }
 0x3b7   :  { %s289_s9 = spop %288 }
 0x3b8   :  { %v233_v7 = vstv %s289_s9 }
 0x3b9   :  { %v234_v9 = vsel %vm232_vm7, %v233_v7, 0.0 }
 0x3ba   :  { %v236_v10 = vsel %vm230_vm8, %v235_v8, %v234_v9 }
 0x3bb   :  { %237 = vst [vmem:[#allocation10] sm:$0xff] %v236_v10 }
 0x3bc   :  { %358 = shalt.err (!%p355_p0)
}
 0x3bd   :  { %257 = dma.vmem_to_hbm [thread:$0]  %s255_s8, 128, %s451_s5, [#allocation11]  }
 0x3be   :  { %369 = dma.done.wait [#allocation8], 128  }
 0x3bf   :  { %370 = vsyncadd [#allocation8], 4294967168 }
 0x3c0   :  { %371 = dma.done.wait [#allocation11], 128  }
 0x3c1   :  { %372 = vsyncadd [#allocation11], 4294967168 }
 0x3c2   :  { %264 = vsyncpa [#allocation7], 1 }
 0x3c3   :  { %265 = vsyncpa [#allocation8], 1 }
 0x3c4   :  { %266 = vsyncpa [#allocation11], 1 }

</bundles_post_ra>
